<compile_context>
chip_gen: v5e
topology: v5e:2x2
jax: 0.10.0
libtpu: 0.0.40
codegen_flags: <defaults>
</compile_context>

<pallas_src>
import functools

import jax
import jax.numpy as jnp
from jax import lax
from jax.experimental import pallas as pl
from jax.experimental.pallas import tpu as pltpu


def mha_kernel(q_ref, kp_ref, vp_ref, wq_ref, wfc_ref, gamma_ref, beta_ref,
               *out_refs, n_head, d_k, d_v, ln_eps, return_attn):
    """One (batch, q-tile) grid step of fused multi-head attention.

    q_ref   : (1, TQ, Dm)       f32 queries (residual path stays f32)
    kp_ref  : (1, Lk, H*d_k)    bf16 pre-projected keys   (k @ Wk^T)
    vp_ref  : (1, Lv, H*d_v)    bf16 pre-projected values (v @ Wv^T)
    wq_ref  : (Dm, H*d_k)       bf16 fused Q projection, 1/sqrt(d_k) folded in
    wfc_ref : (H*d_v, Dm)       bf16 output projection
    gamma_ref / beta_ref : (1, Dm) f32 layer-norm affine
    out_refs: out (1, TQ, Dm) [, attn (1, H, TQ, Lk) bf16]
    """
    out_ref = out_refs[0]
    attn_ref = out_refs[1] if return_attn else None

    q_in = q_ref[0]                                   # (TQ, Dm) f32 residual
    q_bf = q_in.astype(jnp.bfloat16)                  # single cast per tile

    # Fused, lane-dense Q projection on the MXU (scale already folded into wq).
    q_all = jnp.dot(q_bf, wq_ref[...], preferred_element_type=jnp.float32)  # (TQ, H*d_k)

    kp = kp_ref[0]                                    # (Lk, H*d_k) bf16
    vp = vp_ref[0]                                    # (Lv, H*d_v) bf16

    # TODO(synk): optional attention mask (mask is not None path) not implemented.
    # TODO(synk): attn/output dropout are identity here (inference / eval mode).
    o_heads = []
    for h in range(n_head):                           # small static head loop (unrolled)
        qh = q_all[:, h * d_k:(h + 1) * d_k].astype(jnp.bfloat16)   # (TQ, d_k)
        kh = kp[:, h * d_k:(h + 1) * d_k]                           # (Lk, d_k)
        vh = vp[:, h * d_v:(h + 1) * d_v]                           # (Lv, d_v)

        logits = lax.dot_general(
            qh, kh, dimension_numbers=(((1,), (1,)), ((), ())),
            preferred_element_type=jnp.float32)                      # (TQ, Lk) f32

        m = jnp.max(logits, axis=-1, keepdims=True)
        e = jnp.exp(logits - m)
        inv = pl.reciprocal(jnp.sum(e, axis=-1, keepdims=True), approx=True)
        p_bf = (e * inv).astype(jnp.bfloat16)         # softmax probs, one bf16 cast
        if attn_ref is not None:
            attn_ref[0, h, :, :] = p_bf.astype(attn_ref.dtype)

        o_heads.append(jnp.dot(p_bf, vh, preferred_element_type=jnp.float32))  # (TQ, d_v)

    # Lane-dense (TQ, H*d_v) feeds one fused output-projection matmul.
    o_all = jnp.concatenate(o_heads, axis=-1).astype(jnp.bfloat16)
    acc = q_in + jnp.dot(o_all, wfc_ref[...], preferred_element_type=jnp.float32)

    # LayerNorm(eps=1e-6), biased variance, f32.
    mean = jnp.mean(acc, axis=-1, keepdims=True)
    centered = acc - mean
    var = jnp.mean(centered * centered, axis=-1, keepdims=True)
    normed = centered * lax.rsqrt(var + ln_eps)
    out_ref[0] = (normed * gamma_ref[...] + beta_ref[...]).astype(out_ref.dtype)


def _nbytes(shape, dtype):
    n = 1
    for s in shape:
        n *= int(s)
    return n * jnp.dtype(dtype).itemsize


def multi_head_attention_pallas(q, k, v, w_qs, w_ks, w_vs, w_fc, gamma, beta,
                                *, n_head, d_k, d_v, ln_eps=1e-6, tq=None,
                                return_attn=True, attn_dtype=jnp.bfloat16):
    """q,k,v: (B, L, d_model) f32. Weights in PyTorch nn.Linear (out, in) layout."""
    B, Lq, Dm = q.shape
    Lk = k.shape[1]
    Lv = v.shape[1]
    assert Lk == Lv

    if tq is None:
        tq = min(Lq, 128)   # re-derived for v7x's 64 MiB/TC VMEM; raise on v5e/v6e if profitable
    assert Lq % tq == 0

    # --- one-time operand prep (outside the grid) ------------------------------------
    # Fused Q projection with 1/sqrt(d_k) folded in; bf16 for the MXU.
    wq_fused = (w_qs.T / (d_k ** 0.5)).astype(jnp.bfloat16)            # (Dm, H*d_k)
    wfc_fused = w_fc.T.astype(jnp.bfloat16)                            # (H*d_v, Dm)

    # K / V projections done ONCE per batch with plain XLA matmuls (f32), shipped bf16.
    kp = jnp.einsum('bld,ed->ble', k, w_ks).astype(jnp.bfloat16)       # (B, Lk, H*d_k)
    vp = jnp.einsum('bld,ed->ble', v, w_vs).astype(jnp.bfloat16)       # (B, Lv, H*d_v)

    gamma2 = gamma.reshape(1, Dm).astype(jnp.float32)
    beta2 = beta.reshape(1, Dm).astype(jnp.float32)

    grid = (B, Lq // tq)
    kernel = functools.partial(mha_kernel, n_head=n_head, d_k=d_k, d_v=d_v,
                               ln_eps=ln_eps, return_attn=return_attn)

    in_specs = [
        pl.BlockSpec((1, tq, Dm), lambda b, i: (b, i, 0)),             # q tile
        pl.BlockSpec((1, Lk, n_head * d_k), lambda b, i: (b, 0, 0)),   # kp for batch b
        pl.BlockSpec((1, Lv, n_head * d_v), lambda b, i: (b, 0, 0)),   # vp for batch b
        pl.BlockSpec((Dm, n_head * d_k), lambda b, i: (0, 0)),         # wq (resident)
        pl.BlockSpec((n_head * d_v, Dm), lambda b, i: (0, 0)),         # wfc (resident)
        pl.BlockSpec((1, Dm), lambda b, i: (0, 0)),                    # layer-norm gamma
        pl.BlockSpec((1, Dm), lambda b, i: (0, 0)),                    # layer-norm beta
    ]
    out_shapes = [jax.ShapeDtypeStruct((B, Lq, Dm), q.dtype)]
    out_specs = [pl.BlockSpec((1, tq, Dm), lambda b, i: (b, i, 0))]
    if return_attn:
        # TODO(synk): pad Lk to a multiple of 128 (with masking) for fully lane-dense
        # attn stores when Lk is not already 128-aligned at large sizes.
        out_shapes.append(jax.ShapeDtypeStruct((B, n_head, Lq, Lk), attn_dtype))
        out_specs.append(pl.BlockSpec((1, n_head, tq, Lk), lambda b, i: (b, 0, i, 0)))

    # --- explicit VMEM budget (default scoped limit is only 16/32 MiB) ---------------
    block_bytes = (
        2 * (_nbytes((1, tq, Dm), q.dtype)                      # q (double-buffered)
             + _nbytes((1, Lk, n_head * d_k), jnp.bfloat16)     # kp
             + _nbytes((1, Lv, n_head * d_v), jnp.bfloat16)     # vp
             + _nbytes((1, tq, Dm), q.dtype))                   # out
        + _nbytes((Dm, n_head * d_k), jnp.bfloat16)
        + _nbytes((n_head * d_v, Dm), jnp.bfloat16)
        + 2 * _nbytes((1, Dm), jnp.float32))
    if return_attn:
        block_bytes += 2 * _nbytes((1, n_head, tq, Lk), attn_dtype)
    # headroom for in-kernel f32 temporaries (logits / exp / probs / o_all per tile)
    scratch_bytes = 4 * _nbytes((tq, Lk), jnp.float32) + 4 * _nbytes((tq, Dm), jnp.float32)
    vmem_limit = int(min(64 * 2**20, max(32 * 2**20, 2 * (block_bytes + scratch_bytes))))

    flops = (2 * B * Lq * Dm * n_head * d_k            # Q projection
             + 2 * B * n_head * Lq * Lk * d_k          # scores
             + 2 * B * n_head * Lq * Lk * d_v          # probs @ V
             + 2 * B * Lq * n_head * d_v * Dm          # output projection
             + 10 * B * Lq * Dm)                       # softmax / layer-norm elementwise
    transcendentals = B * n_head * Lq * Lk + B * n_head * Lq + B * Lq
    bytes_accessed = (2 * _nbytes((B, Lq, Dm), q.dtype)                # q in, out
                      + _nbytes((B, Lk, n_head * d_k), jnp.bfloat16)
                      + _nbytes((B, Lv, n_head * d_v), jnp.bfloat16)
                      + _nbytes((Dm, n_head * d_k), jnp.bfloat16)
                      + _nbytes((n_head * d_v, Dm), jnp.bfloat16)
                      + 2 * _nbytes((1, Dm), jnp.float32))
    if return_attn:
        bytes_accessed += _nbytes((B, n_head, Lq, Lk), attn_dtype)

    results = pl.pallas_call(
        kernel,
        out_shape=tuple(out_shapes),
        grid_spec=pltpu.PrefetchScalarGridSpec(
            num_scalar_prefetch=0,
            grid=grid,
            in_specs=in_specs,
            out_specs=out_specs,
        ),
        compiler_params=pltpu.CompilerParams(
            dimension_semantics=("parallel", "parallel"),
            vmem_limit_bytes=vmem_limit),
        cost_estimate=pl.CostEstimate(flops=int(flops),
                                      transcendentals=int(transcendentals),
                                      bytes_accessed=int(bytes_accessed)),
    )(q, kp, vp, wq_fused, wfc_fused, gamma2, beta2)

    out = results[0]
    attn = results[1] if return_attn else None
    return out, attn


def mha_ref(q, k, v, w_qs, w_ks, w_vs, w_fc, gamma, beta, *, n_head, d_k, d_v):
    """Pure-JAX fp32 reference mirroring the PyTorch forward (mask=None, eval mode)."""
    B, Lq, Dm = q.shape
    Lk, Lv = k.shape[1], v.shape[1]
    residual = q
    qp = (q @ w_qs.T).reshape(B, Lq, n_head, d_k).transpose(0, 2, 1, 3)
    kp = (k @ w_ks.T).reshape(B, Lk, n_head, d_k).transpose(0, 2, 1, 3)
    vp = (v @ w_vs.T).reshape(B, Lv, n_head, d_v).transpose(0, 2, 1, 3)
    attn = jnp.einsum('bhqd,bhkd->bhqk', qp / (d_k ** 0.5), kp)
    attn = jax.nn.softmax(attn, axis=-1)
    out = jnp.einsum('bhqk,bhkd->bhqd', attn, vp)
    out = out.transpose(0, 2, 1, 3).reshape(B, Lq, n_head * d_v)
    out = out @ w_fc.T + residual
    mean = out.mean(-1, keepdims=True)
    var = ((out - mean) ** 2).mean(-1, keepdims=True)
    out = (out - mean) / jnp.sqrt(var + 1e-6) * gamma + beta
    return out, attn


if __name__ == "__main__":
    n_head, d_model, d_k, d_v = 4, 128, 32, 32
    batch, seq = 2, 8

    key = jax.random.PRNGKey(0)
    kq, kk, kv, k1, k2, k3, k4 = jax.random.split(key, 7)

    q = jax.random.normal(kq, (batch, seq, d_model), jnp.float32)
    k = jax.random.normal(kk, (batch, seq, d_model), jnp.float32)
    v = jax.random.normal(kv, (batch, seq, d_model), jnp.float32)

    # nn.Linear default init: U(-1/sqrt(fan_in), 1/sqrt(fan_in)); PyTorch (out, in) layout.
    b_in = 1.0 / (d_model ** 0.5)
    b_fc = 1.0 / ((n_head * d_v) ** 0.5)
    w_qs = jax.random.uniform(k1, (n_head * d_k, d_model), jnp.float32, -b_in, b_in)
    w_ks = jax.random.uniform(k2, (n_head * d_k, d_model), jnp.float32, -b_in, b_in)
    w_vs = jax.random.uniform(k3, (n_head * d_v, d_model), jnp.float32, -b_in, b_in)
    w_fc = jax.random.uniform(k4, (d_model, n_head * d_v), jnp.float32, -b_fc, b_fc)
    gamma = jnp.ones((d_model,), jnp.float32)
    beta = jnp.zeros((d_model,), jnp.float32)

    out, attn = multi_head_attention_pallas(
        q, k, v, w_qs, w_ks, w_vs, w_fc, gamma, beta,
        n_head=n_head, d_k=d_k, d_v=d_v, return_attn=True)
    out = jax.block_until_ready(out)
    attn = jax.block_until_ready(attn)

    ref_out, ref_attn = mha_ref(q, k, v, w_qs, w_ks, w_vs, w_fc, gamma, beta,
                                n_head=n_head, d_k=d_k, d_v=d_v)

    assert out.shape == (batch, seq, d_model)
    assert attn.shape == (batch, n_head, seq, seq)
    attn_f32 = attn.astype(jnp.float32)
    assert jnp.allclose(out, ref_out, atol=2e-2, rtol=2e-2), (
        f"out mismatch: max abs err {jnp.max(jnp.abs(out - ref_out))}")
    assert jnp.allclose(attn_f32, ref_attn, atol=2e-2, rtol=2e-2), (
        f"attn mismatch: max abs err {jnp.max(jnp.abs(attn_f32 - ref_attn))}")

    print("KERNEL_OK")
</pallas_src>

<mosaic_0001>
module attributes {stable_mosaic.version = 11 : i64} {
  func.func @mha_kernel(%arg0: i32, %arg1: i32, %arg2: memref<1x8x128xf32, #tpu.memory_space<vmem>>, %arg3: memref<1x8x128xbf16, #tpu.memory_space<vmem>>, %arg4: memref<1x8x128xbf16, #tpu.memory_space<vmem>>, %arg5: memref<128x128xbf16, #tpu.memory_space<vmem>>, %arg6: memref<128x128xbf16, #tpu.memory_space<vmem>>, %arg7: memref<1x128xf32, #tpu.memory_space<vmem>>, %arg8: memref<1x128xf32, #tpu.memory_space<vmem>>, %arg9: memref<1x8x128xf32, #tpu.memory_space<vmem>>, %arg10: memref<1x4x8x8xbf16, #tpu.memory_space<vmem>>) attributes {dimension_semantics = [#tpu.dimension_semantics<parallel>, #tpu.dimension_semantics<parallel>], iteration_bounds = array<i64: 2, 1>, scalar_prefetch = 0 : i64, scratch_operands = 0 : i64, tpu.core_type = #tpu.core_type<tc>, window_params = [{transform_indices = @transform_0, window_bounds = array<i64: 1, 8, 128>}, {transform_indices = @transform_1, window_bounds = array<i64: 1, 8, 128>}, {transform_indices = @transform_2, window_bounds = array<i64: 1, 8, 128>}, {pipeline_mode = #tpu.pipeline_mode<synchronous>, transform_indices = @transform_3, window_bounds = array<i64: 128, 128>}, {pipeline_mode = #tpu.pipeline_mode<synchronous>, transform_indices = @transform_4, window_bounds = array<i64: 128, 128>}, {pipeline_mode = #tpu.pipeline_mode<synchronous>, transform_indices = @transform_5, window_bounds = array<i64: 1, 128>}, {pipeline_mode = #tpu.pipeline_mode<synchronous>, transform_indices = @transform_6, window_bounds = array<i64: 1, 128>}, {transform_indices = @transform_7, window_bounds = array<i64: 1, 8, 128>}, {transform_indices = @transform_8, window_bounds = array<i64: 1, 4, 8, 8>}]} {
    %c0 = arith.constant 0 : index
    %c0_0 = arith.constant 0 : index
    %c0_1 = arith.constant 0 : index
    %0 = vector.load %arg2[%c0, %c0_0, %c0_1] : memref<1x8x128xf32, #tpu.memory_space<vmem>>, vector<1x8x128xf32>
    %1 = vector.shape_cast %0 : vector<1x8x128xf32> to vector<8x128xf32>
    %2 = arith.truncf %1 : vector<8x128xf32> to vector<8x128xbf16>
    %c0_2 = arith.constant 0 : index
    %c0_3 = arith.constant 0 : index
    %3 = vector.load %arg5[%c0_2, %c0_3] : memref<128x128xbf16, #tpu.memory_space<vmem>>, vector<128x128xbf16>
    %cst = arith.constant dense<0.000000e+00> : vector<8x128xf32>
    %4 = tpu.matmul %2, %3, %cst {dimension_numbers = #tpu.dot_dimension_numbers<[1], [0], [0], [1], [0, 0, 1, 1], [], []>} : vector<8x128xbf16>, vector<128x128xbf16>, vector<8x128xf32> -> vector<8x128xf32>
    %c0_4 = arith.constant 0 : index
    %c0_5 = arith.constant 0 : index
    %c0_6 = arith.constant 0 : index
    %5 = vector.load %arg3[%c0_4, %c0_5, %c0_6] : memref<1x8x128xbf16, #tpu.memory_space<vmem>>, vector<1x8x128xbf16>
    %6 = vector.shape_cast %5 : vector<1x8x128xbf16> to vector<8x128xbf16>
    %c0_7 = arith.constant 0 : index
    %c0_8 = arith.constant 0 : index
    %c0_9 = arith.constant 0 : index
    %7 = vector.load %arg4[%c0_7, %c0_8, %c0_9] : memref<1x8x128xbf16, #tpu.memory_space<vmem>>, vector<1x8x128xbf16>
    %8 = vector.shape_cast %7 : vector<1x8x128xbf16> to vector<8x128xbf16>
    %9 = vector.extract_strided_slice %4 {offsets = [0, 0], sizes = [8, 32], strides = [1, 1]} : vector<8x128xf32> to vector<8x32xf32>
    %10 = arith.truncf %9 : vector<8x32xf32> to vector<8x32xbf16>
    %11 = vector.extract_strided_slice %6 {offsets = [0, 0], sizes = [8, 32], strides = [1, 1]} : vector<8x128xbf16> to vector<8x32xbf16>
    %12 = vector.extract_strided_slice %8 {offsets = [0, 0], sizes = [8, 32], strides = [1, 1]} : vector<8x128xbf16> to vector<8x32xbf16>
    %cst_10 = arith.constant dense<0.000000e+00> : vector<8x8xf32>
    %13 = tpu.matmul %10, %11, %cst_10 {dimension_numbers = #tpu.dot_dimension_numbers<[1], [1], [0], [0], [0, 0, 1, 0], [], []>} : vector<8x32xbf16>, vector<8x32xbf16>, vector<8x8xf32> -> vector<8x8xf32>
    %cst_11 = arith.constant dense<0xFF800000> : vector<8xf32>
    %14 = vector.multi_reduction <maximumf>, %13, %cst_11 [1] : vector<8x8xf32> to vector<8xf32>
    %15 = vector.shape_cast %14 : vector<8xf32> to vector<8x1xf32>
    %16 = vector.broadcast %15 : vector<8x1xf32> to vector<8x8xf32>
    %17 = arith.subf %13, %16 : vector<8x8xf32>
    %18 = math.exp %17 : vector<8x8xf32>
    %cst_12 = arith.constant dense<0.000000e+00> : vector<8xf32>
    %19 = vector.multi_reduction <add>, %18, %cst_12 [1] : vector<8x8xf32> to vector<8xf32>
    %20 = vector.shape_cast %19 : vector<8xf32> to vector<8x1xf32>
    %21 = tpu.reciprocal %20 {approx = true} : vector<8x1xf32> -> vector<8x1xf32>
    %22 = vector.broadcast %21 : vector<8x1xf32> to vector<8x8xf32>
    %23 = arith.mulf %18, %22 : vector<8x8xf32>
    %24 = arith.truncf %23 : vector<8x8xf32> to vector<8x8xbf16>
    %c0_13 = arith.constant 0 : index
    %c0_14 = arith.constant 0 : index
    %c0_15 = arith.constant 0 : index
    %c0_16 = arith.constant 0 : index
    %25 = vector.load %arg10[%c0_13, %c0_14, %c0_15, %c0_16] : memref<1x4x8x8xbf16, #tpu.memory_space<vmem>>, vector<1x1x8x8xbf16>
    %26 = vector.shape_cast %25 : vector<1x1x8x8xbf16> to vector<8x8xbf16>
    %27 = vector.shape_cast %24 : vector<8x8xbf16> to vector<1x1x8x8xbf16>
    tpu.vector_store %arg10[%c0_13, %c0_14, %c0_15, %c0_16], %27 {strides = array<i32>} : memref<1x4x8x8xbf16, #tpu.memory_space<vmem>>, vector<1x1x8x8xbf16>,
    %cst_17 = arith.constant dense<0.000000e+00> : vector<8x32xf32>
    %28 = tpu.matmul %24, %12, %cst_17 {dimension_numbers = #tpu.dot_dimension_numbers<[1], [0], [0], [1], [0, 0, 1, 1], [], []>} : vector<8x8xbf16>, vector<8x32xbf16>, vector<8x32xf32> -> vector<8x32xf32>
    %29 = vector.extract_strided_slice %4 {offsets = [0, 32], sizes = [8, 32], strides = [1, 1]} : vector<8x128xf32> to vector<8x32xf32>
    %30 = arith.truncf %29 : vector<8x32xf32> to vector<8x32xbf16>
    %31 = vector.extract_strided_slice %6 {offsets = [0, 32], sizes = [8, 32], strides = [1, 1]} : vector<8x128xbf16> to vector<8x32xbf16>
    %32 = vector.extract_strided_slice %8 {offsets = [0, 32], sizes = [8, 32], strides = [1, 1]} : vector<8x128xbf16> to vector<8x32xbf16>
    %cst_18 = arith.constant dense<0.000000e+00> : vector<8x8xf32>
    %33 = tpu.matmul %30, %31, %cst_18 {dimension_numbers = #tpu.dot_dimension_numbers<[1], [1], [0], [0], [0, 0, 1, 0], [], []>} : vector<8x32xbf16>, vector<8x32xbf16>, vector<8x8xf32> -> vector<8x8xf32>
    %cst_19 = arith.constant dense<0xFF800000> : vector<8xf32>
    %34 = vector.multi_reduction <maximumf>, %33, %cst_19 [1] : vector<8x8xf32> to vector<8xf32>
    %35 = vector.shape_cast %34 : vector<8xf32> to vector<8x1xf32>
    %36 = vector.broadcast %35 : vector<8x1xf32> to vector<8x8xf32>
    %37 = arith.subf %33, %36 : vector<8x8xf32>
    %38 = math.exp %37 : vector<8x8xf32>
    %cst_20 = arith.constant dense<0.000000e+00> : vector<8xf32>
    %39 = vector.multi_reduction <add>, %38, %cst_20 [1] : vector<8x8xf32> to vector<8xf32>
    %40 = vector.shape_cast %39 : vector<8xf32> to vector<8x1xf32>
    %41 = tpu.reciprocal %40 {approx = true} : vector<8x1xf32> -> vector<8x1xf32>
    %42 = vector.broadcast %41 : vector<8x1xf32> to vector<8x8xf32>
    %43 = arith.mulf %38, %42 : vector<8x8xf32>
    %44 = arith.truncf %43 : vector<8x8xf32> to vector<8x8xbf16>
    %c0_21 = arith.constant 0 : index
    %c1 = arith.constant 1 : index
    %c0_22 = arith.constant 0 : index
    %c0_23 = arith.constant 0 : index
    %45 = vector.load %arg10[%c0_21, %c1, %c0_22, %c0_23] : memref<1x4x8x8xbf16, #tpu.memory_space<vmem>>, vector<1x1x8x8xbf16>
    %46 = vector.shape_cast %45 : vector<1x1x8x8xbf16> to vector<8x8xbf16>
    %47 = vector.shape_cast %44 : vector<8x8xbf16> to vector<1x1x8x8xbf16>
    tpu.vector_store %arg10[%c0_21, %c1, %c0_22, %c0_23], %47 {strides = array<i32>} : memref<1x4x8x8xbf16, #tpu.memory_space<vmem>>, vector<1x1x8x8xbf16>,
    %cst_24 = arith.constant dense<0.000000e+00> : vector<8x32xf32>
    %48 = tpu.matmul %44, %32, %cst_24 {dimension_numbers = #tpu.dot_dimension_numbers<[1], [0], [0], [1], [0, 0, 1, 1], [], []>} : vector<8x8xbf16>, vector<8x32xbf16>, vector<8x32xf32> -> vector<8x32xf32>
    %49 = vector.extract_strided_slice %4 {offsets = [0, 64], sizes = [8, 32], strides = [1, 1]} : vector<8x128xf32> to vector<8x32xf32>
    %50 = arith.truncf %49 : vector<8x32xf32> to vector<8x32xbf16>
    %51 = vector.extract_strided_slice %6 {offsets = [0, 64], sizes = [8, 32], strides = [1, 1]} : vector<8x128xbf16> to vector<8x32xbf16>
    %52 = vector.extract_strided_slice %8 {offsets = [0, 64], sizes = [8, 32], strides = [1, 1]} : vector<8x128xbf16> to vector<8x32xbf16>
    %cst_25 = arith.constant dense<0.000000e+00> : vector<8x8xf32>
    %53 = tpu.matmul %50, %51, %cst_25 {dimension_numbers = #tpu.dot_dimension_numbers<[1], [1], [0], [0], [0, 0, 1, 0], [], []>} : vector<8x32xbf16>, vector<8x32xbf16>, vector<8x8xf32> -> vector<8x8xf32>
    %cst_26 = arith.constant dense<0xFF800000> : vector<8xf32>
    %54 = vector.multi_reduction <maximumf>, %53, %cst_26 [1] : vector<8x8xf32> to vector<8xf32>
    %55 = vector.shape_cast %54 : vector<8xf32> to vector<8x1xf32>
    %56 = vector.broadcast %55 : vector<8x1xf32> to vector<8x8xf32>
    %57 = arith.subf %53, %56 : vector<8x8xf32>
    %58 = math.exp %57 : vector<8x8xf32>
    %cst_27 = arith.constant dense<0.000000e+00> : vector<8xf32>
    %59 = vector.multi_reduction <add>, %58, %cst_27 [1] : vector<8x8xf32> to vector<8xf32>
    %60 = vector.shape_cast %59 : vector<8xf32> to vector<8x1xf32>
    %61 = tpu.reciprocal %60 {approx = true} : vector<8x1xf32> -> vector<8x1xf32>
    %62 = vector.broadcast %61 : vector<8x1xf32> to vector<8x8xf32>
    %63 = arith.mulf %58, %62 : vector<8x8xf32>
    %64 = arith.truncf %63 : vector<8x8xf32> to vector<8x8xbf16>
    %c0_28 = arith.constant 0 : index
    %c2 = arith.constant 2 : index
    %c0_29 = arith.constant 0 : index
    %c0_30 = arith.constant 0 : index
    %65 = vector.load %arg10[%c0_28, %c2, %c0_29, %c0_30] : memref<1x4x8x8xbf16, #tpu.memory_space<vmem>>, vector<1x1x8x8xbf16>
    %66 = vector.shape_cast %65 : vector<1x1x8x8xbf16> to vector<8x8xbf16>
    %67 = vector.shape_cast %64 : vector<8x8xbf16> to vector<1x1x8x8xbf16>
    tpu.vector_store %arg10[%c0_28, %c2, %c0_29, %c0_30], %67 {strides = array<i32>} : memref<1x4x8x8xbf16, #tpu.memory_space<vmem>>, vector<1x1x8x8xbf16>,
    %cst_31 = arith.constant dense<0.000000e+00> : vector<8x32xf32>
    %68 = tpu.matmul %64, %52, %cst_31 {dimension_numbers = #tpu.dot_dimension_numbers<[1], [0], [0], [1], [0, 0, 1, 1], [], []>} : vector<8x8xbf16>, vector<8x32xbf16>, vector<8x32xf32> -> vector<8x32xf32>
    %69 = vector.extract_strided_slice %4 {offsets = [0, 96], sizes = [8, 32], strides = [1, 1]} : vector<8x128xf32> to vector<8x32xf32>
    %70 = arith.truncf %69 : vector<8x32xf32> to vector<8x32xbf16>
    %71 = vector.extract_strided_slice %6 {offsets = [0, 96], sizes = [8, 32], strides = [1, 1]} : vector<8x128xbf16> to vector<8x32xbf16>
    %72 = vector.extract_strided_slice %8 {offsets = [0, 96], sizes = [8, 32], strides = [1, 1]} : vector<8x128xbf16> to vector<8x32xbf16>
    %cst_32 = arith.constant dense<0.000000e+00> : vector<8x8xf32>
    %73 = tpu.matmul %70, %71, %cst_32 {dimension_numbers = #tpu.dot_dimension_numbers<[1], [1], [0], [0], [0, 0, 1, 0], [], []>} : vector<8x32xbf16>, vector<8x32xbf16>, vector<8x8xf32> -> vector<8x8xf32>
    %cst_33 = arith.constant dense<0xFF800000> : vector<8xf32>
    %74 = vector.multi_reduction <maximumf>, %73, %cst_33 [1] : vector<8x8xf32> to vector<8xf32>
    %75 = vector.shape_cast %74 : vector<8xf32> to vector<8x1xf32>
    %76 = vector.broadcast %75 : vector<8x1xf32> to vector<8x8xf32>
    %77 = arith.subf %73, %76 : vector<8x8xf32>
    %78 = math.exp %77 : vector<8x8xf32>
    %cst_34 = arith.constant dense<0.000000e+00> : vector<8xf32>
    %79 = vector.multi_reduction <add>, %78, %cst_34 [1] : vector<8x8xf32> to vector<8xf32>
    %80 = vector.shape_cast %79 : vector<8xf32> to vector<8x1xf32>
    %81 = tpu.reciprocal %80 {approx = true} : vector<8x1xf32> -> vector<8x1xf32>
    %82 = vector.broadcast %81 : vector<8x1xf32> to vector<8x8xf32>
    %83 = arith.mulf %78, %82 : vector<8x8xf32>
    %84 = arith.truncf %83 : vector<8x8xf32> to vector<8x8xbf16>
    %c0_35 = arith.constant 0 : index
    %c3 = arith.constant 3 : index
    %c0_36 = arith.constant 0 : index
    %c0_37 = arith.constant 0 : index
    %85 = vector.load %arg10[%c0_35, %c3, %c0_36, %c0_37] : memref<1x4x8x8xbf16, #tpu.memory_space<vmem>>, vector<1x1x8x8xbf16>
    %86 = vector.shape_cast %85 : vector<1x1x8x8xbf16> to vector<8x8xbf16>
    %87 = vector.shape_cast %84 : vector<8x8xbf16> to vector<1x1x8x8xbf16>
    tpu.vector_store %arg10[%c0_35, %c3, %c0_36, %c0_37], %87 {strides = array<i32>} : memref<1x4x8x8xbf16, #tpu.memory_space<vmem>>, vector<1x1x8x8xbf16>,
    %cst_38 = arith.constant dense<0.000000e+00> : vector<8x32xf32>
    %88 = tpu.matmul %84, %72, %cst_38 {dimension_numbers = #tpu.dot_dimension_numbers<[1], [0], [0], [1], [0, 0, 1, 1], [], []>} : vector<8x8xbf16>, vector<8x32xbf16>, vector<8x32xf32> -> vector<8x32xf32>
    %89 = tpu.concatenate %28, %48, %68, %88 in 1 : vector<8x32xf32>, vector<8x32xf32>, vector<8x32xf32>, vector<8x32xf32> -> vector<8x128xf32>
    %90 = arith.truncf %89 : vector<8x128xf32> to vector<8x128xbf16>
    %c0_39 = arith.constant 0 : index
    %c0_40 = arith.constant 0 : index
    %91 = vector.load %arg6[%c0_39, %c0_40] : memref<128x128xbf16, #tpu.memory_space<vmem>>, vector<128x128xbf16>
    %cst_41 = arith.constant dense<0.000000e+00> : vector<8x128xf32>
    %92 = tpu.matmul %90, %91, %cst_41 {dimension_numbers = #tpu.dot_dimension_numbers<[1], [0], [0], [1], [0, 0, 1, 1], [], []>} : vector<8x128xbf16>, vector<128x128xbf16>, vector<8x128xf32> -> vector<8x128xf32>
    %93 = arith.addf %1, %92 : vector<8x128xf32>
    %cst_42 = arith.constant dense<0.000000e+00> : vector<8xf32>
    %94 = vector.multi_reduction <add>, %93, %cst_42 [1] : vector<8x128xf32> to vector<8xf32>
    %95 = vector.shape_cast %94 : vector<8xf32> to vector<8x1xf32>
    %cst_43 = arith.constant 1.280000e+02 : f32
    %96 = vector.broadcast %cst_43 : f32 to vector<8x1xf32>
    %97 = arith.divf %95, %96 : vector<8x1xf32>
    %98 = vector.broadcast %97 : vector<8x1xf32> to vector<8x128xf32>
    %99 = arith.subf %93, %98 : vector<8x128xf32>
    %100 = arith.mulf %99, %99 : vector<8x128xf32>
    %cst_44 = arith.constant dense<0.000000e+00> : vector<8xf32>
    %101 = vector.multi_reduction <add>, %100, %cst_44 [1] : vector<8x128xf32> to vector<8xf32>
    %102 = vector.shape_cast %101 : vector<8xf32> to vector<8x1xf32>
    %cst_45 = arith.constant 1.280000e+02 : f32
    %103 = vector.broadcast %cst_45 : f32 to vector<8x1xf32>
    %104 = arith.divf %102, %103 : vector<8x1xf32>
    %cst_46 = arith.constant 9.99999997E-7 : f32
    %105 = vector.broadcast %cst_46 : f32 to vector<8x1xf32>
    %106 = arith.addf %104, %105 : vector<8x1xf32>
    %107 = math.rsqrt %106 : vector<8x1xf32>
    %108 = vector.broadcast %107 : vector<8x1xf32> to vector<8x128xf32>
    %109 = arith.mulf %99, %108 : vector<8x128xf32>
    %c0_47 = arith.constant 0 : index
    %c0_48 = arith.constant 0 : index
    %110 = vector.load %arg7[%c0_47, %c0_48] : memref<1x128xf32, #tpu.memory_space<vmem>>, vector<1x128xf32>
    %111 = vector.broadcast %110 : vector<1x128xf32> to vector<8x128xf32>
    %112 = arith.mulf %109, %111 : vector<8x128xf32>
    %c0_49 = arith.constant 0 : index
    %c0_50 = arith.constant 0 : index
    %113 = vector.load %arg8[%c0_49, %c0_50] : memref<1x128xf32, #tpu.memory_space<vmem>>, vector<1x128xf32>
    %114 = vector.broadcast %113 : vector<1x128xf32> to vector<8x128xf32>
    %115 = arith.addf %112, %114 : vector<8x128xf32>
    %c0_51 = arith.constant 0 : index
    %c0_52 = arith.constant 0 : index
    %c0_53 = arith.constant 0 : index
    %116 = vector.load %arg9[%c0_51, %c0_52, %c0_53] : memref<1x8x128xf32, #tpu.memory_space<vmem>>, vector<1x8x128xf32>
    %117 = vector.shape_cast %116 : vector<1x8x128xf32> to vector<8x128xf32>
    %118 = vector.shape_cast %115 : vector<8x128xf32> to vector<1x8x128xf32>
    tpu.vector_store %arg9[%c0_51, %c0_52, %c0_53], %118 {strides = array<i32>} : memref<1x8x128xf32, #tpu.memory_space<vmem>>, vector<1x8x128xf32>,
    return
  }
  func.func @transform_0(%arg0: i32, %arg1: i32) -> (i32, i32, i32) {
    %c0_i32 = arith.constant 0 : i32
    %c0_i32_0 = arith.constant 0 : i32
    return %arg0, %arg1, %c0_i32 : i32, i32, i32
  }
  func.func @transform_1(%arg0: i32, %arg1: i32) -> (i32, i32, i32) {
    %c0_i32 = arith.constant 0 : i32
    %c0_i32_0 = arith.constant 0 : i32
    %c0_i32_1 = arith.constant 0 : i32
    return %arg0, %c0_i32, %c0_i32_0 : i32, i32, i32
  }
  func.func @transform_2(%arg0: i32, %arg1: i32) -> (i32, i32, i32) {
    %c0_i32 = arith.constant 0 : i32
    %c0_i32_0 = arith.constant 0 : i32
    %c0_i32_1 = arith.constant 0 : i32
    return %arg0, %c0_i32, %c0_i32_0 : i32, i32, i32
  }
  func.func @transform_3(%arg0: i32, %arg1: i32) -> (i32, i32) {
    %c0_i32 = arith.constant 0 : i32
    %c0_i32_0 = arith.constant 0 : i32
    %c0_i32_1 = arith.constant 0 : i32
    return %c0_i32, %c0_i32_0 : i32, i32
  }
  func.func @transform_4(%arg0: i32, %arg1: i32) -> (i32, i32) {
    %c0_i32 = arith.constant 0 : i32
    %c0_i32_0 = arith.constant 0 : i32
    %c0_i32_1 = arith.constant 0 : i32
    return %c0_i32, %c0_i32_0 : i32, i32
  }
  func.func @transform_5(%arg0: i32, %arg1: i32) -> (i32, i32) {
    %c0_i32 = arith.constant 0 : i32
    %c0_i32_0 = arith.constant 0 : i32
    %c0_i32_1 = arith.constant 0 : i32
    return %c0_i32, %c0_i32_0 : i32, i32
  }
  func.func @transform_6(%arg0: i32, %arg1: i32) -> (i32, i32) {
    %c0_i32 = arith.constant 0 : i32
    %c0_i32_0 = arith.constant 0 : i32
    %c0_i32_1 = arith.constant 0 : i32
    return %c0_i32, %c0_i32_0 : i32, i32
  }
  func.func @transform_7(%arg0: i32, %arg1: i32) -> (i32, i32, i32) {
    %c0_i32 = arith.constant 0 : i32
    %c0_i32_0 = arith.constant 0 : i32
    return %arg0, %arg1, %c0_i32 : i32, i32, i32
  }
  func.func @transform_8(%arg0: i32, %arg1: i32) -> (i32, i32, i32, i32) {
    %c0_i32 = arith.constant 0 : i32
    %c0_i32_0 = arith.constant 0 : i32
    %c0_i32_1 = arith.constant 0 : i32
    return %arg0, %c0_i32, %arg1, %c0_i32_0 : i32, i32, i32, i32
  }
}

</mosaic_0001>

<bundles_post_ra>
// kernel: tpu_custom_call.1
= control target key start
LH: loop header
LB: loop body
LE: loop exit
PB: predicated region body
PF: predicated region fallthrough
CT: control target
= control target key end

     0   :  { %s1988_s0 = inlined_call_operand.hbm [shape: f32[2,8,128], index: 0, kind: input, shape index: {}]   ;;  %s1989_s1 = inlined_call_operand.hbm [shape: bf16[2,8,128], index: 1, kind: input, shape index: {}]   ;;  %s1990_s2 = inlined_call_operand.hbm [shape: bf16[2,8,128], index: 2, kind: input, shape index: {}]   ;;  %s1991_s3 = inlined_call_operand.hbm [shape: bf16[128,128], index: 3, kind: input, shape index: {}]   ;;  %s1992_s4 = inlined_call_operand.hbm [shape: bf16[128,128], index: 4, kind: input, shape index: {}]   ;;  %s1993_s5 = inlined_call_operand.vmem [shape: f32[1,128], index: 5, kind: input, shape index: {}]   ;;  %s1994_s6 = inlined_call_operand.vmem [shape: f32[1,128], index: 6, kind: input, shape index: {}]   ;;  %s1995_s7 = inlined_call_operand.hbm [shape: f32[2,8,128], index: 7, kind: output, shape index: {0}]   ;;  %s1996_s8 = inlined_call_operand.hbm [shape: bf16[2,4,8,8], index: 8, kind: output, shape index: {1}]  }
   0x1   :  { %2006 = sst [smem:[#allocation25_spill]] %s1989_s1 }
   0x2   :  { %2007 = sst [smem:[#allocation26_spill]] %s1990_s2 }
   0x3   :  { %2008 = sst [smem:[#allocation27_spill]] %s1991_s3 }
   0x4   :  { %2009 = sst [smem:[#allocation28_spill]] %s1993_s5 }
   0x5   :  { %2010 = sst [smem:[#allocation29_spill]] %s1994_s6 }
   0x6   :  { %2011 = sst [smem:[#allocation30_spill]] %s1995_s7 }
   0x7   :  { %14 = vsyncpa [#allocation3], 0 }
   0x8   :  { %16 = vsyncpa [#allocation3 + $0x1], 0 }
   0x9   :  { %17 = vsyncpa [#allocation6], 0 }
   0xa   :  { %19 = vsyncpa [#allocation6 + $0x1], 0 }
   0xb   :  { %20 = vsyncpa [#allocation9], 0 }
   0xc   :  { %21 = vsyncpa [#allocation4], 0 }
   0xd   :  { %23 = vsyncpa [#allocation4 + $0x1], 0 }
   0xe   :  { %24 = vsyncpa [#allocation13], 0 }
   0xf   :  { %26 = vsyncpa [#allocation13 + $0x1], 0  ;;  %s1705_s27 = smov 0   ;;  %s1707_s28 = smov 0  }
  0x10   :  { %s1709_s29 = smov 0   ;;  %s1711_s30 = smov 0  }
  0x11   :  { %s1713_s9 = smov 0   ;;  %s1715_s10 = smov 0  }
  0x12 LB: > { %2012 = sst [smem:[#allocation19_spill]] %s1629_s27  ;;  %s1736_s11 = sadd.s32 4294967295, %s1649_s10   ;;  %s1649_s10 = sphi %s1715_s10, %s32_s10   ;;  %s1645_s9 = sphi %s1713_s9, %s2042_s9   ;;  %s1641_s30 = sphi %s1711_s30, %s2041_s30   ;;  %s1637_s29 = sphi %s1709_s29, %s2037_s29   ;;  %s1633_s28 = sphi %s1707_s28, %s2040_s28   ;;  %s1629_s27 = sphi %s1705_s27, %s2039_s27  }
  0x13   : > { %2013 = sst [smem:[#allocation20_spill]] %s1637_s29  ;;  %p1133_p0 = scmp.ge.s32.totalorder %s1649_s10, 1 }
  0x14   : > { %2014 = sst [smem:[#allocation21_spill]] %s1649_s10  ;;  %p67_p1 = scmp.eq.s32.totalorder %s1736_s11, 0 }
  0x15   : > { %p269_p2 = scmp.lt.s32.totalorder %s1649_s10, 3  ;;  %s2015_s3 = sld [smem:[#allocation27_spill]] }
  0x16   : > { %s1651_s16 = smov [#allocation8]   ;;  %s1997_s19 = smov 64  }
  0x17   : > { %p1744_p3 = pnand %p1133_p0, %p269_p2  ;;  %s282_s17 = sshll.u32 %s1651_s16, 4  ;;  %s283_s17 = int_to_ptr.vmem [resolvable:$true] %s282_s17 }
  0x18   : > { %s1998_s20 = smov 4   ;;  %s1132_s21 = sadd.s32 4294967294, %s1649_s10  }
  0x19   : > { %p1268_p4 = pneg %p1744_p3  ;;  %s44_s22 = sadd.s32 1, %s1645_s9 }
  0x1a   : > { %s53_s23 = sadd.s32 1, %s1637_s29  ;;  %p46_p7 = scmp.ge.s32.totalorder %s44_s22, 2 }
  0x1b   : > { %s280_s14 = sshll.u32 %s2015_s3, 4  ;;  %p1752_p5 = pnand %p1268_p4, %p67_p1  ;;  %s281_s14 = int_to_ptr.hbm [resolvable:$true] %s280_s14 }
  0x1c   : > { %p60_p8 = scmp.ne.s32.totalorder %s1637_s29, %s1633_s28  ;;  %p61_p9 = scmp.eq.s32.totalorder %s1649_s10, 0 }
  0x1d   : > { %1271 = dma.hbm_to_vmem [thread:$0]  (!%p1752_p5), %s281_s14, 1024, %s283_s17, [#allocation9], %s1997_s19, %s1997_s19, %s1998_s20  }
  0x1e   : > { %p66_p10 = scmp.ne.s32.totalorder %s1633_s28, %s1629_s27  ;;  %s2044_s22 = smov (%p46_p7, %s44_s22), 0 }
  0x1f   : > { %2018 = sst [smem:[#allocation22_spill]] %s2044_s22  ;;  %p62_p11 = por %p61_p9, %p60_p8 }
  0x20   : > { %p1774_p12 = por %p67_p1, %p66_p10  ;;  %s48_s25 = ssub.s32 %s1645_s9, %s2044_s22 }
  0x21   : > { %p228_p13 = scmp.eq.s32.totalorder %s1736_s11, 1  ;;  %p51_p0 = scmp.eq.s32.totalorder %s48_s25, 0 }
  0x22   : > { %p234_p2 = scmp.eq.s32.totalorder %s1132_s21, 1  ;;  %p1294_p6 = scmp.lt.s32.totalorder %s1649_s10, 2 }
  0x23   : > { %p1781_p4 = por %p228_p13, %p60_p8  ;;  %s1794_s14 = sand.u32 1, %s1637_s29  }
  0x24   : > { %s1787_s12 = scalar_select %p51_p0, %s1637_s29, %s53_s23  }
  0x25   : > { %p1789_p7 = por %p234_p2, %p66_p10  ;;  %p1796_p9 = pnand %p1294_p6, %p62_p11 }
  0x26   : > { %2021 = sst [smem:[#allocation23_spill]] %s1787_s12  ;;  %s336_s17 = sand.u32 1, %s1649_s10  }
  0x27   : > { %s2022_s13 = scalar_select %p1789_p7, 1, 0 }
  0x28   : > { %s1139_s21 = sshll.u32 %s1794_s14, 2  ;;  %s1140_s25 = sshll.u32 %s1645_s9, 2 }
  0x29   : > { %2023 = sst [smem:[#allocation24_spill]] %s2022_s13  ;;  %s340_s19 = scalar_lea.vmem [#allocation5], %s1139_s21 }
  0x2a   : > { %s348_s23 = sshll.u32 %s340_s19, 4  ;;  %s2025_s1 = sld [smem:[#allocation25_spill]]  ;;  %s349_s23 = int_to_ptr.vmem [resolvable:$true] %s348_s23 }
  0x2b   : > { %s2026_s2 = sld [smem:[#allocation26_spill]]  ;;  %s337_s6 = scalar_lea.sflag [#allocation6], %s336_s17 }
  0x2c   : > { %s294_s19 = sshll.u32 %s1992_s4, 4  ;;  %s1654_s5 = smov [#allocation10]   ;;  %s295_s19 = int_to_ptr.hbm [resolvable:$true] %s294_s19 }
  0x2d   : > { %s296_s3 = sshll.u32 %s1654_s5, 4  ;;  %s2027_s20 = smov 4   ;;  %s297_s3 = int_to_ptr.vmem [resolvable:$true] %s296_s3 }
  0x2e   : > { %s1137_s29 = sshll.u32 %s1794_s14, 3  ;;  %s1138_s13 = sshll.u32 %s1645_s9, 3 }
  0x2f   : > { %s320_s7 = scalar_lea.vmem [#allocation2], %s1137_s29  ;;  %s359_s18 = scalar_lea.vmem [#allocation7], %s1139_s21 }
  0x30   : > { %s344_s22 = scalar_lea.hbm %s2025_s1, %s1140_s25  ;;  %s329_s10 = sshll.u32 %s320_s7, 4  ;;  %s330_s10 = int_to_ptr.vmem [resolvable:$true] %s329_s10 }
  0x31   : > { %s346_s12 = sshll.u32 %s344_s22, 4  ;;  %s363_s27 = scalar_lea.hbm %s2026_s2, %s1140_s25  ;;  %s347_s12 = int_to_ptr.hbm [resolvable:$true] %s346_s12 }
  0x32   : > { %1281 = dma.hbm_to_vmem [thread:$0]  (!%p1796_p9), %s347_s12, 64, %s349_s23, %s337_s6  }
  0x33   : > { %s2028_s22 = smov 64   ;;  %s325_s12 = scalar_lea.hbm %s1988_s0, %s1138_s13 }
  0x34   : > { %1274 = dma.hbm_to_vmem [thread:$0]  (!%p1752_p5), %s295_s19, 1024, %s297_s3, [#allocation9], %s2028_s22, %s2028_s22, %s2027_s20  }
  0x35   : > { %s327_s23 = sshll.u32 %s325_s12, 4  ;;  %s317_s1 = scalar_lea.sflag [#allocation3], %s1794_s14  ;;  %s328_s23 = int_to_ptr.hbm [resolvable:$true] %s327_s23 }
  0x36   : > { %1278 = dma.hbm_to_vmem [thread:$0]  (!%p1796_p9), %s328_s23, 128, %s330_s10, %s317_s1  }
  0x37   : > { %s365_s5 = sshll.u32 %s363_s27, 4  ;;  %s367_s2 = sshll.u32 %s359_s18, 4  ;;  %s366_s5 = int_to_ptr.hbm [resolvable:$true] %s365_s5  ;;  %s368_s2 = int_to_ptr.vmem [resolvable:$true] %s367_s2 }
  0x38   : > { %1284 = dma.hbm_to_vmem [thread:$0]  (!%p1796_p9), %s366_s5, 64, %s368_s2, %s337_s6  }
  0x39   : > { %376 = sbr.rel (%p1744_p3) target bundleno = 1776 (0x6f0), region = 48  ;;  %s1832_s19 = sand.u32 (!%p1744_p3), 1, %s1633_s28  }
  0x3a   : > { %s1144_s14 = sshll.u32 (!%p1744_p3), %s1832_s19, 3  ;;  %s379_s3 = scalar_lea.sflag (!%p1744_p3), [#allocation3], %s1832_s19 }
  0x3b   : > { %s1838_s1 = scalar_lea.vmem (!%p1744_p3), [#allocation2], %s1144_s14 }
  0x3e   : > { %1608 = dma.done.wait (%p1774_p12), %s379_s3, 128  }
  0x3f   : > { %1610 = vsyncadd (%p1774_p12), %s379_s3, 4294967168  ;;  %s388_s2 = sand.u32 1, %s1736_s11   ;;  %s1145_s6 = sshll.u32 %s1832_s19, 2 }
  0x40   : > { %s389_s27 = scalar_lea.sflag [#allocation6], %s388_s2  ;;  %s392_s15 = scalar_lea.vmem [#allocation5], %s1145_s6 }
  0x41   : > { %1612 = dma.done.wait (%p1774_p12), %s389_s27, 128  }
  0x42   : > { %1614 = vsyncadd (%p1774_p12), %s389_s27, 4294967168  ;;  %s1850_s16 = scalar_lea.vmem [#allocation7], %s1145_s6 }
  0x43   : > { %1616 = dma.done.wait (%p67_p1), [#allocation9], 2048  }
  0x44   : > { %1618 = vsyncadd (%p67_p1), [#allocation9], 4294965248  ;;  %v1240_v0 = vld [vmem:[#allocation8 + $0x38] sm:$0xff]  ;;  %vm544_vm0 = vcmask 261120   ;;  %v1239_v1 = vld [vmem:[#allocation8 + $0x30] sm:$0xff]  ;;  %s1655_s24 = smov 96  }
  0x45   : > { %528 = vmatpush.bf16.msra.mxu0 %v1240_v0  ;;  %v541_v2 = vld [vmem:[%s392_s15] sm:$0xf]  ;;  %v1238_v5 = vld [vmem:[#allocation8 + $0x28] sm:$0xff]  ;;  %v1237_v7 = vld [vmem:[#allocation8 + $0x20] sm:$0xff]  ;;  %s1656_s11 = smov 64   ;;  %s1657_s21 = smov 32  }
  0x46   : > { %v603_v3 = vunpack.c.l.b16 %v541_v2  ;;  %v549_v4 = vsel %vm544_vm0, %v541_v2, 0  ;;  %v1236_v8 = vld [vmem:[#allocation8 + $0x18] sm:$0xff]  ;;  %v1235_v9 = vld [vmem:[#allocation8 + $0x10] sm:$0xff]  ;;  %v1234_v10 = vld [vmem:[#allocation8 + $0x8] sm:$0xff]  ;;  %vm564_vm1 = vcmask 64512   ;;  %vm582_vm2 = vcmask 1043456  }
  0x47   : > { %558 = vmatpush.bf16.xpose.msra.mxu1 %v549_v4  ;;  %v1233_v11 = vld [vmem:[#allocation8] sm:$0xff]  ;;  %v542_v17 = vld [vmem:[%s1850_s16] sm:$0xf]  ;;  %s1150_s20 = sshll.u32 %s1832_s19, 4  ;;  %vm577_vm3 = vcmask 60416   ;;  %vm793_vm4 = vcmask 523264  }
  0x48   : > { %v1857_v6 = vpack.c.b16 %v603_v3, %v603_v3  ;;  %v1862_v12 = vld [vmem:[%s1838_s1] sm:$0xff]  ;;  %v641_v19 = vunpack.c.l.b16 %v542_v17  ;;  %v584_v34 = vsel %vm582_vm2, %v542_v17, 0  ;;  %s1886_s22 = scalar_lea.vmem [#allocation12], %s1150_s20  ;;  %vm795_vm5 = vcmask 785408   ;;  %s1249_s29 = sshll.u32 %s1641_s30, 4 }
  0x49   : > { %529 = vmatpush.bf16.msra.mxu0 %v1239_v1  ;;  %v463_v13 = vpack.c.bf16 %v1862_v12, %v1862_v12  ;;  %593 = vmatpush.bf16.msra.mxu2 %v584_v34  ;;  %s948_s13 = sshll.u32 %s1886_s22, 4  ;;  %s947_s12 = scalar_lea.hbm %s1996_s8, %s1249_s29  ;;  %s949_s13 = int_to_ptr.vmem [resolvable:$true] %s948_s13 }
  0x4a   : > { %605 = vrot.lane.b32.xlu0 %v1857_v6, %s1655_s24  ;;  %v1870_v20 = vpack.c.b16 %v641_v19, %v641_v19  ;;  %s950_s23 = sshll.u32 %s947_s12, 4  ;;  %s920_s7 = scalar_lea.sflag [#allocation13], %s1832_s19  ;;  %s951_s23 = int_to_ptr.hbm [resolvable:$true] %s950_s23 }
  0x4b   : > { %s1541_s10 = sshra.s32 %s951_s23, 4  ;;  %s1547_s1 = scalar_lea.hbm %s1996_s8, 32  ;;  %s1542_s10 = int_to_ptr.hbm [resolvable:$true] %s1541_s10 }
  0x4c   : > { %s1543_s5 = scalar_lea.hbm %s1542_s10, 16  ;;  %p1548_p6 = scmp.lt.s32.totalorder %s1542_s10, %s1996_s8 }
  0x4d   : > { %530 = vmatpush.bf16.msra.mxu0 %v1238_v5  ;;  %p1544_p1 = scmp.ne.s32.totalorder %s1542_s10, %s1543_s5  ;;  %p1549_p8 = scmp.lt.s32.totalorder %s1547_s1, %s1543_s5 }
  0x4f   : > { %p1545_p3 = pnand %p1544_p1, %p1781_p4  ;;  %p1550_p10 = por %p1549_p8, %p1548_p6 }
  0x51   : > { %531 = vmatpush.bf16.msra.mxu0 %v1237_v7  ;;  %p1546_p5 = pneg %p1545_p3 }
  0x53   : > { %p1551_p11 = pnand %p1550_p10, %p1546_p5 }
  0x55   : > { %532 = vmatpush.bf16.msra.mxu0 %v1236_v8 }
  0x59   : > { %533 = vmatpush.bf16.msra.mxu0 %v1235_v9 }
  0x5d   : > { %534 = vmatpush.bf16.msra.mxu0 %v1234_v10 }
  0x61   : > { %535 = vmatpush.bf16.msra.mxu0 %v1233_v11 }
  0x64   : > { %536 = vmatmul.bf16.vlgmr.msra.gmra.mxu0 %v463_v13 }
  0xbc   : > { %v606_v14 = vpop.permute.xlu0 %605 }
  0xbd   : > { %v611_v15 = vsel %vm544_vm0, %v606_v14, 0 }
  0xbe   : > { %620 = vmatpush.bf16.xpose.msrb.mxu0 %v611_v15 }
  0xe1   : > { %v537_v16 = vpop.f32.mrf.mxu0 }
  0xe2   : > { %v543_v18 = vpack.c.bf16 %v537_v16, %v537_v16 }
  0xe4   : > { %600 = vrot.lane.b32.xlu0 %v543_v18, %s1655_s24  ;;  %1183 = vmatmul.msk.bf16.vlgmr.msra.gmra.mxu1 %vm544_vm0, %v543_v18 }
  0xe9   : > { %v539_v21 = vpop.f32.mrf.mxu0 }
  0xec   : > { %643 = vrot.lane.b32.xlu0 %v1870_v20, %s1655_s24 }
  0xf4   : > { %664 = vrot.lane.b32.xlu0 %v543_v18, %s1656_s11 }
  0xfc   : > { %722 = vrot.lane.b32.xlu0 %v543_v18, %s1657_s21 }
 0x156   : > { %v601_v22 = vpop.permute.xlu0 %600 }
 0x157   : > { %1185 = vmatmul.msk.bf16.vlgmr.msrb.gmra.mxu0 %vm544_vm0, %v601_v22 }
 0x15e   : > { %v644_v38 = vpop.permute.xlu0 %643 }
 0x15f   : > { %v649_v39 = vsel %vm582_vm2, %v644_v38, 0 }
 0x160   : > { %658 = vmatpush.bf16.msrb.mxu2 %v649_v39 }
 0x161   : > { %v560_v23 = vpop.f32.mrf.mxu1 }
 0x162   : > { %v565_v24 = vsel %vm564_vm1, %v560_v23, -inf }
 0x163   : > { %566 = vmax.xlane.f32.xlu1 %v565_v24 }
 0x166   : > { %v665_v48 = vpop.permute.xlu0 %664 }
 0x169   : > { %v562_v25 = vpop.f32.mrf.mxu1 }
 0x16e   : > { %v723_v55 = vpop.permute.xlu0 %722 }
 0x1d4   : > { %v622_v26 = vpop.f32.mrf.mxu0 }
 0x1d5   : > { %v626_v27 = vsel %vm564_vm1, %v622_v26, -inf }
 0x1d6   : > { %v567_v28 = vpop.xlane.xlu1 %566  ;;  %627 = vmax.xlane.f32.xlu1 %v626_v27  ;;  %v1248_v27 = vld [vmem:[#allocation10 + $0x38] sm:$0xff] }
 0x1d7   : > { %v568_v29 = vsub.f32 %v560_v23, %v567_v28  ;;  %v1247_v28 = vld [vmem:[#allocation10 + $0x30] sm:$0xff] }
 0x1d9   : > { %v569_v30 = vmul.f32 1.442695, %v568_v29  ;;  %v1246_v29 = vld [vmem:[#allocation10 + $0x28] sm:$0xff] }
 0x1db   : > { %1357 = vpow2.f32 %v569_v30  ;;  %v1245_v30 = vld [vmem:[#allocation10 + $0x20] sm:$0xff] }
 0x1dc   : > { %v624_v31 = vpop.f32.mrf.mxu0 }
 0x1dd   : > { %v1244_v31 = vld [vmem:[#allocation10 + $0x18] sm:$0xff] }
 0x1e1   : > { %v1358_v32 = vpop.eup %1357 }
 0x1e2   : > { %v571_v33 = vsel %vm564_vm1, %v1358_v32, 0.0 }
 0x1e3   : > { %572 = vadd.xlane.f32.xlu2 %v571_v33  ;;  %v1242_v33 = vld [vmem:[#allocation10 + $0x8] sm:$0xff] }
 0x1ef   : > { %666 = vrot.lane.b32.xlu1 %v1857_v6, %s1656_s11 }
 0x249   : > { %v628_v35 = vpop.xlane.xlu1 %627 }
 0x24a   : > { %v629_v36 = vsub.f32 %v622_v26, %v628_v35 }
 0x24c   : > { %v630_v37 = vmul.f32 1.442695, %v629_v36  ;;  %v1241_v36 = vld [vmem:[#allocation10] sm:$0xff] }
 0x24e   : > { %1359 = vpow2.f32 %v630_v37 }
 0x254   : > { %v1360_v40 = vpop.eup %1359 }
 0x255   : > { %v632_v41 = vsel %vm564_vm1, %v1360_v40, 0.0 }
 0x256   : > { %v573_v42 = vpop.xlane.xlu2 %572  ;;  %633 = vadd.xlane.f32.xlu2 %v632_v41 }
 0x257   : > { %1361 = vrcp.f32 %v573_v42 }
 0x25d   : > { %v1362_v43 = vpop.eup %1361 }
 0x25e   : > { %v575_v44 = vmul.f32 %v1362_v43, %v1358_v32  ;;  %v1243_v32 = vld [vmem:[#allocation10 + $0x10] sm:$0xff] }
 0x260   : > { %v576_v45 = vpack.c.bf16 %v575_v44, %v575_v44 }
 0x261   : > { %v667_v46 = vpop.permute.xlu1 %666 }
 0x262   : > { %578 = vst.msk [vmem:[%s1886_s22] sm:$0xf] %vm577_vm3, %v576_v45  ;;  %1184 = vmatmul.msk.bf16.vlgmr.msra.gmra.mxu2 %vm564_vm1, %v576_v45  ;;  %v672_v47 = vsel %vm544_vm0, %v667_v46, 0 }
 0x263   : > { %681 = vmatpush.bf16.xpose.msrb.mxu1 %v672_v47  ;;  %v1658_v47 = vmov 128.0  }
 0x26a   : > { %1188 = vmatmul.msk.bf16.vlgmr.msrb.gmra.mxu1 %vm544_vm0, %v665_v48 }
 0x26e   : > { %724 = vrot.lane.b32.xlu2 %v1857_v6, %s1657_s21 }
 0x2c9   : > { %v634_v49 = vpop.xlane.xlu2 %633 }
 0x2ca   : > { %1363 = vrcp.f32 %v634_v49 }
 0x2d0   : > { %v1364_v50 = vpop.eup %1363 }
 0x2d1   : > { %v636_v51 = vmul.f32 %v1364_v50, %v1360_v40  ;;  %v725_v52 = vpop.permute.xlu2 %724 }
 0x2d2   : > { %v730_v53 = vsel %vm544_vm0, %v725_v52, 0 }
 0x2d3   : > { %v637_v54 = vpack.c.bf16 %v636_v51, %v636_v51  ;;  %739 = vmatpush.bf16.xpose.msra.mxu2 %v730_v53 }
 0x2d5   : > { %1186 = vst.msk [vmem:[%s1886_s22 + $0x4] sm:$0xf] %vm577_vm3, %v637_v54  ;;  %1187 = vmatmul.msk.bf16.vlgmr.msrb.gmra.mxu2 %vm564_vm1, %v637_v54 }
 0x2e5   : > { %v1899_v56 = vpop.f32.mrf.mxu2  ;;  %1191 = vmatmul.msk.bf16.vlgmr.msra.gmra.mxu2 %vm544_vm0, %v723_v55 }
 0x2e7   : > { %v683_v57 = vpop.f32.mrf.mxu1 }
 0x2e8   : > { %v687_v58 = vsel %vm564_vm1, %v683_v57, -inf }
 0x2e9   : > { %688 = vmax.xlane.f32.xlu0 %v687_v58 }
 0x2ed   : > { %v597_v59 = vpop.f32.mrf.mxu2 }
 0x2ef   : > { %v685_v60 = vpop.f32.mrf.mxu1 }
 0x2fd   : > { %701 = vrot.lane.b32.xlu0 %v1870_v20, %s1656_s11 }
 0x358   : > { %v660_v61 = vpop.f32.mrf.mxu2 }
 0x35c   : > { %v689_v62 = vpop.xlane.xlu0 %688 }
 0x35d   : > { %v690_v63 = vsub.f32 %v683_v57, %v689_v62 }
 0x35f   : > { %v691_v0 = vmul.f32 1.442695, %v690_v63 }
 0x360   : > { %v662_v1 = vpop.f32.mrf.mxu2 }
 0x361   : > { %1365 = vpow2.f32 %v691_v0 }
 0x367   : > { %v1366_v2 = vpop.eup %1365 }
 0x368   : > { %v741_v3 = vpop.f32.mrf.mxu2  ;;  %v693_v4 = vsel %vm564_vm1, %v1366_v2, 0.0 }
 0x369   : > { %694 = vadd.xlane.f32.xlu1 %v693_v4  ;;  %v745_v5 = vsel %vm564_vm1, %v741_v3, -inf }
 0x36a   : > { %746 = vmax.xlane.f32.xlu2 %v745_v5 }
 0x36f   : > { %v702_v7 = vpop.permute.xlu0 %701 }
 0x370   : > { %v743_v6 = vpop.f32.mrf.mxu2  ;;  %v707_v8 = vsel %vm582_vm2, %v702_v7, 0 }
 0x371   : > { %716 = vmatpush.bf16.msra.mxu3 %v707_v8 }
 0x375   : > { %862 = vmatpush.bf16.msrb.mxu3 %v1248_v27 }
 0x379   : > { %863 = vmatpush.bf16.msrb.mxu3 %v1247_v28 }
 0x37d   : > { %864 = vmatpush.bf16.msrb.mxu3 %v1246_v29 }
 0x381   : > { %865 = vmatpush.bf16.msrb.mxu3 %v1245_v30 }
 0x382   : > { %759 = vrot.lane.b32.xlu1 %v1870_v20, %s1657_s21 }
 0x385   : > { %866 = vmatpush.bf16.msrb.mxu3 %v1244_v31 }
 0x389   : > { %867 = vmatpush.bf16.msrb.mxu3 %v1243_v32 }
 0x38d   : > { %868 = vmatpush.bf16.msrb.mxu3 %v1242_v33 }
 0x391   : > { %869 = vmatpush.bf16.msrb.mxu3 %v1241_v36 }
 0x3dc   : > { %v695_v9 = vpop.xlane.xlu1 %694 }
 0x3dd   : > { %1367 = vrcp.f32 %v695_v9  ;;  %v747_v10 = vpop.xlane.xlu2 %746 }
 0x3de   : > { %v748_v11 = vsub.f32 %v741_v3, %v747_v10 }
 0x3e0   : > { %v749_v13 = vmul.f32 1.442695, %v748_v11 }
 0x3e2   : > { %1369 = vpow2.f32 %v749_v13 }
 0x3e3   : > { %v1368_v14 = vpop.eup %1367 }
 0x3e4   : > { %v697_v15 = vmul.f32 %v1368_v14, %v1366_v2 }
 0x3e6   : > { %v698_v16 = vpack.c.bf16 %v697_v15, %v697_v15 }
 0x3e8   : > { %v1370_v17 = vpop.eup %1369  ;;  %1189 = vst.msk [vmem:[%s1886_s22 + $0x8] sm:$0xf] %vm577_vm3, %v698_v16  ;;  %1190 = vmatmul.msk.bf16.vlgmr.msra.gmra.mxu3 %vm564_vm1, %v698_v16 }
 0x3e9   : > { %v751_v18 = vsel %vm564_vm1, %v1370_v17, 0.0 }
 0x3ea   : > { %752 = vadd.xlane.f32.xlu2 %v751_v18 }
 0x3f4   : > { %v760_v19 = vpop.permute.xlu1 %759 }
 0x3f5   : > { %v765_v20 = vsel %vm582_vm2, %v760_v19, 0 }
 0x3f6   : > { %774 = vmatpush.bf16.msra.mxu1 %v765_v20 }
 0x402   : > { %781 = vrot.lane.b32.xlu2 %v660_v61, %s1657_s21 }
 0x45d   : > { %v753_v21 = vpop.xlane.xlu2 %752 }
 0x45e   : > { %1371 = vrcp.f32 %v753_v21 }
 0x45f   : > { %1373 = vrcp.f32 %v1658_v47 }
 0x464   : > { %v1372_v22 = vpop.eup %1371 }
 0x465   : > { %v755_v23 = vmul.f32 %v1372_v22, %v1370_v17  ;;  %v782_v37 = vpop.permute.xlu2 %781  ;;  %v1374_v48 = vpop.eup %1373 }
 0x466   : > { %v792_v39 = vsel %vm544_vm0, %v1899_v56, %v782_v37  ;;  %v879_v49 = vmul.f32 128.0, %v1374_v48  ;;  %vm883_vm6 = vweird.f32 %v1374_v48 }
 0x467   : > { %v756_v24 = vpack.c.bf16 %v755_v23, %v755_v23 }
 0x468   : > { %v880_v50 = vsub.f32 1.0, %v879_v49 }
 0x469   : > { %1192 = vst.msk [vmem:[%s1886_s22 + $0xc] sm:$0xf] %vm577_vm3, %v756_v24  ;;  %1193 = vmatmul.msk.bf16.vlgmr.msra.gmra.mxu1 %vm564_vm1, %v756_v24 }
 0x46a   : > { %v881_v51 = vmul.f32 %v1374_v48, %v880_v50 }
 0x46b   : > { %v718_v25 = vpop.f32.mrf.mxu3 }
 0x46c   : > { %785 = vrot.lane.b32.xlu0 %v718_v25, %s1656_s11  ;;  %v882_v52 = vadd.f32 %v1374_v48, %v881_v51 }
 0x46e   : > { %v884_v53 = vsel %vm883_vm6, %v1374_v48, %v882_v52 }
 0x473   : > { %v720_v26 = vpop.f32.mrf.mxu3 }
 0x4de   : > { %v786_v38 = vpop.permute.xlu0 %785 }
 0x4df   : > { %v794_v40 = vsel %vm793_vm4, %v792_v39, %v786_v38 }
 0x4e6   : > { %v776_v34 = vpop.f32.mrf.mxu1 }
 0x4e7   : > { %789 = vrot.lane.b32.xlu1 %v776_v34, %s1655_s24 }
 0x4ee   : > { %v778_v35 = vpop.f32.mrf.mxu1 }
 0x559   : > { %v790_v41 = vpop.permute.xlu1 %789 }
 0x55a   : > { %v796_v42 = vsel %vm795_vm5, %v794_v40, %v790_v41 }
 0x55b   : > { %v797_v43 = vpack.c.bf16 %v796_v42, %v796_v42 }
 0x55d   : > { %870 = vmatmul.bf16.vlgmr.msrb.gmra.mxu3 %v797_v43 }
 0x5e0   : > { %v871_v44 = vpop.f32.mrf.mxu3 }
 0x5e1   : > { %v875_v45 = vadd.f32 %v871_v44, %v1862_v12 }
 0x5e3   : > { %876 = vadd.xlane.f32.xlu0 %v875_v45 }
 0x5e8   : > { %v873_v46 = vpop.f32.mrf.mxu3 }
 0x656   : > { %v877_v54 = vpop.xlane.xlu0 %876 }
 0x657   : > { %v885_v55 = vmul.f32 %v884_v53, %v877_v54 }
 0x659   : > { %v886_v56 = vsub.f32 %v875_v45, %v885_v55 }
 0x65b   : > { %v887_v57 = vmul.f32 %v886_v56, %v886_v56 }
 0x65d   : > { %888 = vadd.xlane.f32.xlu2 %v887_v57 }
 0x65e   : > { %1554 = shalt.err (!%p1551_p11)
}
 0x65f   : > { %s1659_s27 = smov 4   ;;  %s1228_s15 = sshll.u32 %s1641_s30, 3 }
 0x660   : > { %1265 = dma.vmem_to_hbm [thread:$0]  (%p1781_p4), %s949_s13, 256, %s951_s23, %s920_s7, %s1656_s11, %s1656_s11, %s1659_s27  }
 0x661   : > { %s2029_s21 = sld [smem:[#allocation28_spill]]  ;;  %s453_s30 = scalar_lea.vmem [#allocation11], %s1144_s14 }
 0x662   : > { %s2030_s22 = sld [smem:[#allocation30_spill]]  ;;  %s933_s12 = sshll.u32 %s453_s30, 4  ;;  %s934_s12 = int_to_ptr.vmem [resolvable:$true] %s933_s12 }
 0x663   : > { %s2031_s25 = sld [smem:[#allocation29_spill]]  ;;  %s915_s7 = scalar_lea.sflag [#allocation4], %s1832_s19 }
 0x667   : > { %v1355_v2 = vld [vmem:[%s2029_s21] ss:$0 sm:$0xff] }
 0x668   : > { %s931_s29 = scalar_lea.hbm %s2030_s22, %s1228_s15  ;;  %s1575_s1 = scalar_lea.hbm %s2030_s22, 16 }
 0x669   : > { %v1356_v5 = vld [vmem:[%s2031_s25] ss:$0 sm:$0xff]  ;;  %s935_s23 = sshll.u32 %s931_s29, 4  ;;  %s936_s23 = int_to_ptr.hbm [resolvable:$true] %s935_s23 }
 0x66a   : > { %s1569_s10 = sshra.s32 %s936_s23, 4  ;;  %s1570_s10 = int_to_ptr.hbm [resolvable:$true] %s1569_s10 }
 0x66b   : > { %s1571_s5 = scalar_lea.hbm %s1570_s10, 8  ;;  %p1576_p2 = scmp.lt.s32.totalorder %s1570_s10, %s2030_s22 }
 0x66c   : > { %p1572_p12 = scmp.ne.s32.totalorder %s1570_s10, %s1571_s5  ;;  %p1577_p9 = scmp.lt.s32.totalorder %s1575_s1, %s1571_s5 }
 0x66e   : > { %p1573_p13 = pnand %p1572_p12, %p1781_p4  ;;  %p1578_p1 = por %p1577_p9, %p1576_p2 }
 0x670   : > { %p1574_p0 = pneg %p1573_p13 }
 0x672   : > { %p1579_p3 = pnand %p1578_p1, %p1574_p0 }
 0x6d0   : > { %v889_v12 = vpop.xlane.xlu2 %888 }
 0x6d1   : > { %v890_v58 = vmul.f32 %v889_v12, %v884_v53 }
 0x6d3   : > { %v891_v59 = vadd.f32 1e-06, %v890_v58 }
 0x6d5   : > { %1375 = vrsqrt.f32 %v891_v59  ;;  %vm898_vm8 = vweird.f32 %v891_v59 }
 0x6db   : > { %v1376_v60 = vpop.eup %1375 }
 0x6dc   : > { %v893_v61 = vmul.f32 %v1376_v60, %v891_v59  ;;  %vm899_vm7 = vweird.f32 %v1376_v60 }
 0x6dd   : > { %vm900_vm9 = vmor %vm898_vm8, %vm899_vm7 }
 0x6de   : > { %v894_v62 = vmul.f32 %v1376_v60, %v893_v61 }
 0x6e0   : > { %v895_v63 = vmul.f32 0.5, %v894_v62 }
 0x6e2   : > { %v896_v0 = vsub.f32 1.5, %v895_v63 }
 0x6e4   : > { %v897_v1 = vmul.f32 %v1376_v60, %v896_v0 }
 0x6e6   : > { %v901_v3 = vsel %vm900_vm9, %v1376_v60, %v897_v1 }
 0x6e7   : > { %v902_v4 = vmul.f32 %v901_v3, %v886_v56 }
 0x6e9   : > { %v907_v6 = vmul.f32 %v1355_v2, %v902_v4 }
 0x6eb   : > { %v912_v7 = vadd.f32 %v1356_v5, %v907_v6 }
 0x6ed   : > { %913 = vst [vmem:[%s453_s30] sm:$0xff] %v912_v7 }
 0x6ee   : > { %1582 = shalt.err (!%p1579_p3)
}
 0x6ef   : > { %1264 = dma.vmem_to_hbm [thread:$0]  (%p1781_p4), %s934_s12, 128, %s936_s23, %s915_s7  }
 0x6f0 PF: > { %s2032_s19 = sld [smem:[#allocation19_spill]] }
 0x6f1   : > { %s2034_s27 = sld [smem:[#allocation21_spill]] }
 0x6f6   : > { %s965_s15 = sand.u32 1, %s2032_s19  }
 0x6f7   : > { %p2035_p5 = scmp.ge.s32.totalorder %s2034_s27, 2  ;;  %s966_s16 = scalar_lea.sflag [#allocation4], %s965_s15 }
 0x6f9   : > { %p1286_p6 = pnand %p2035_p5, %p1789_p7 }
 0x6fb   : > { %p1287_p8 = pneg %p1286_p6 }
 0x6fd   : > { %1620 = dma.done.wait (%p1287_p8), %s966_s16, 128  }
 0x6fe   : > { %1622 = vsyncadd (%p1287_p8), %s966_s16, 4294967168  ;;  %s976_s24 = scalar_lea.sflag [#allocation13], %s965_s15 }
 0x6ff   : > { %1624 = dma.done.wait (%p1287_p8), %s976_s24, 256  }
 0x700   : > { %1626 = vsyncadd (%p1287_p8), %s976_s24, 4294967040  ;;  %s32_s10 = sadd.s32 1, %s2034_s27   ;;  %s2036_s26 = sld [smem:[#allocation20_spill]] }
 0x701   : > { %p29_p10 = scmp.ge.s32.totalorder %s32_s10, 4   ;;  %s2037_s29 = sld [smem:[#allocation23_spill]] }
 0x702   : > { %s2038_s21 = sld [smem:[#allocation22_spill]]  ;;  %s2039_s27 = smov %s1633_s28 }
 0x703   : > { %s2041_s30 = smov %s1645_s9 }
 0x704   :  { %31 = sbr.rel (!%p29_p10) target bundleno = 18 (0x12), region = 145 }
 0x706   : > { %s2040_s28 = smov %s2036_s26 }
 0x708   : > { %s2042_s9 = smov %s2038_s21 }
 0x709   :  { %982 = vsyncpa [#allocation3], 1 }
 0x70a   :  { %984 = vsyncpa [#allocation3 + $0x1], 1 }
 0x70b   :  { %985 = vsyncpa [#allocation6], 1 }
 0x70c   :  { %987 = vsyncpa [#allocation6 + $0x1], 1 }
 0x70d   :  { %988 = vsyncpa [#allocation9], 1 }
 0x70e   :  { %989 = vsyncpa [#allocation4], 1 }
 0x70f   :  { %991 = vsyncpa [#allocation4 + $0x1], 1 }
 0x710   :  { %992 = vsyncpa [#allocation13], 1 }
 0x711   :  { %994 = vsyncpa [#allocation13 + $0x1], 1 }

</bundles_post_ra>
